<compile_context>
chip_gen: v7x
topology: tpu7x:2x2x1
jax: 0.10.0
libtpu: 0.0.40
codegen_flags: <defaults>
</compile_context>

<pallas_src>
import functools

import jax
import jax.numpy as jnp
import numpy as np
from jax.experimental import pallas as pl
from jax.experimental.pallas import tpu as pltpu


# ----------------------------------------------------------------------------
# Pallas kernel: one (T, B_TILE) tile -> one (2, B_TILE) packed output tile.
# ----------------------------------------------------------------------------
def _program_kernel(v1_ref, series_ref, out_ref, *,
                    operator_type: str, T: int,
                    combine_w: float, combine_b: float):
    v = series_ref[...]                                      # (T, Bt) f32
    row = jax.lax.broadcasted_iota(jnp.int32, v.shape, 0)    # sublane (=time) idx

    def capped_relu(x, cap):
        return jnp.clip(x, 0.0, cap)

    # Forward difference computed once (sign-invariant zero mask on last row):
    #   diff[j, :] = 0.1 * (v[j+1, :] - v[j, :])  for j < T-1, else 0
    # jnp.roll (constant, non-negative-safe) is used instead of pltpu.roll
    # because pltpu.roll rejects negative shifts; shifts are along sublanes.
    nxt = jnp.roll(v, -1, axis=0)                            # nxt[j] = v[(j+1) % T]
    diff = jnp.where(row < T - 1, 0.1 * (nxt - v), 0.0)

    if operator_type in ('increase', 'decrease'):
        r = capped_relu(diff if operator_type == 'increase' else -diff, 0.2)
        # ret[T-1, :] = ret[T-2, :]
        r = jnp.where(row == T - 1, jnp.roll(r, 1, axis=0), r)
    else:  # 'peak' / 'trough'
        if operator_type == 'peak':
            ret1 = capped_relu(diff, 0.2)
            ret2 = capped_relu(-diff, 0.2)
        else:  # 'trough'
            ret1 = capped_relu(-diff, 0.2)
            ret2 = capped_relu(diff, 0.2)
        # a[j] = 0.3*ret1[j-2] + 0.7*ret1[j-1]
        a = 0.3 * jnp.roll(ret1, 2, axis=0) + 0.7 * jnp.roll(ret1, 1, axis=0)
        # b[j] = 0.7*ret2[j]   + 0.3*ret2[j+1]
        b = 0.7 * ret2 + 0.3 * jnp.roll(ret2, -1, axis=0)
        r = jnp.sqrt(jnp.maximum(a * 0.5 * b, 0.0))
        r = jnp.where((row >= 2) & (row <= T - 3), r, 0.0)
        r = capped_relu(r * 2.0, 0.0)                        # literal torch: cap=0 => 0
    v2 = r                                                   # (T, Bt)

    # combine: score = sum_j v1[j] * v2[j, :]  (12-deep sublane reduce,
    # produces a lane-dense (1, Bt) row directly)
    v1 = v1_ref[...]                                         # (T, 1) broadcast over lanes
    score = jnp.sum(v1 * v2, axis=0, keepdims=True)          # (1, Bt)
    v3 = jax.nn.sigmoid(combine_w * score + combine_b)       # (1, Bt)

    # packed lane-dense output slab: row 0 = v3, row 1 = score
    out_ref[0:1, :] = v3
    out_ref[1:2, :] = score


# ----------------------------------------------------------------------------
# Wrapper
# ----------------------------------------------------------------------------
@functools.partial(jax.jit, static_argnames=(
    "operator_type", "combine_w", "combine_b", "get_score_also", "b_tile"))
def simple_program_forward(series, locate_w, *, operator_type='increase',
                           combine_w=4.0, combine_b=-0.25,
                           get_score_also=False, b_tile=512):
    """Pallas-fused SimpleProgramType.forward (l2_mode/analysis_mode = False)."""
    series = jnp.asarray(series, jnp.float32)
    B, T = series.shape
    locate_w = jnp.asarray(locate_w, jnp.float32).reshape(-1)
    assert locate_w.shape[0] == T

    # Locate softmax hoisted out of the kernel (depends only on locate_w).
    v1 = jax.nn.softmax(locate_w)[:, None]                   # (T, 1)

    # (T, B) layout: batch on the lane axis, time on sublanes.
    series_t = series.T                                      # (T, B)

    # Batch tile: multiple of 128 lanes, at most the padded batch.
    bt = max(128, min(int(b_tile), pl.cdiv(B, 128) * 128))
    bt -= bt % 128
    B_pad = pl.cdiv(B, bt) * bt
    if B_pad != B:
        series_t = jnp.pad(series_t, ((0, 0), (0, B_pad - B)))

    kernel = functools.partial(_program_kernel, operator_type=operator_type,
                               T=T, combine_w=combine_w, combine_b=combine_b)
    out = pl.pallas_call(
        kernel,
        out_shape=jax.ShapeDtypeStruct((2, B_pad), jnp.float32),
        grid=(B_pad // bt,),
        in_specs=[pl.BlockSpec((T, 1), lambda i: (0, 0)),    # precomputed locate softmax
                  pl.BlockSpec((T, bt), lambda i: (0, i))],  # batch tile of the series
        out_specs=pl.BlockSpec((2, bt), lambda i: (0, i)),   # packed (v3, score) slab
        compiler_params=pltpu.CompilerParams(
            dimension_semantics=("parallel",)),              # shard batch tiles across TCs
    )(v1, series_t)

    v3 = out[0, :B].reshape(B, 1)
    score = out[1, :B].reshape(B, 1)
    if get_score_also:
        return v3, score
    return v3


# ----------------------------------------------------------------------------
# Pure-JAX reference (mirrors the torch loops literally)
# ----------------------------------------------------------------------------
def _capped_relu_ref(x, cap):
    return jnp.clip(x, 0.0, cap)


def _attend_ref(values, operator_type):
    B, sz = values.shape
    ret = jnp.zeros_like(values)
    if operator_type in ('increase', 'decrease'):
        for j in range(sz - 1):
            d = (values[:, j + 1] - values[:, j]) if operator_type == 'increase' \
                else (values[:, j] - values[:, j + 1])
            ret = ret.at[:, j].set(d)
        ret = _capped_relu_ref(ret * 0.1, 0.2)
        ret = ret.at[:, sz - 1].set(ret[:, sz - 2])
        return ret
    # peak / trough
    ret1 = jnp.zeros_like(values)
    ret2 = jnp.zeros_like(values)
    for j in range(sz - 1):
        up = 0.1 * (values[:, j + 1] - values[:, j])
        dn = 0.1 * (values[:, j] - values[:, j + 1])
        if operator_type == 'peak':
            ret1 = ret1.at[:, j].set(up)
            ret2 = ret2.at[:, j].set(dn)
        else:  # trough
            ret1 = ret1.at[:, j].set(dn)
            ret2 = ret2.at[:, j].set(up)
    ret1 = _capped_relu_ref(ret1, 0.2)
    ret2 = _capped_relu_ref(ret2, 0.2)
    wt1 = jnp.array([[0.3, 0.7]], jnp.float32)
    wt2 = jnp.array([[0.7, 0.3]], jnp.float32)
    for j in range(2, sz - 2):
        s1 = jnp.sum(wt1 * ret1[:, j - 2:j], axis=1)
        s2 = jnp.sum(wt2 * ret2[:, j:j + 2], axis=1)
        ret = ret.at[:, j].set(jnp.sqrt(s1 * 0.5 * s2))
    return _capped_relu_ref(ret * 2.0, 0.0)


def _forward_ref(series, locate_w, operator_type, combine_w=4.0, combine_b=-0.25):
    v1 = jax.nn.softmax(locate_w.reshape(1, -1), axis=1)
    v2 = _attend_ref(series, operator_type)
    score = jnp.sum(v1 * v2, axis=1, keepdims=True)
    v3 = jax.nn.sigmoid(combine_w * score + combine_b)
    return v3, score


# ----------------------------------------------------------------------------
if __name__ == "__main__":
    T = 12  # AttendModule default inp_length
    key = jax.random.PRNGKey(0)
    k_small, k_big = jax.random.split(key)
    locate_w = jnp.arange(T, dtype=jnp.float32) * 0.1 - 0.5   # deterministic locate params

    # Small batch (module-sized) — all four operator types.
    B_small = 8
    series_small = jax.random.normal(k_small, (B_small, T), dtype=jnp.float32) * 2.0
    for op in ('increase', 'decrease', 'peak', 'trough'):
        out = simple_program_forward(series_small, locate_w, operator_type=op)
        out = jax.block_until_ready(out)
        ref_v3, _ = _forward_ref(series_small, locate_w, op)
        np.testing.assert_allclose(np.asarray(out), np.asarray(ref_v3),
                                   rtol=1e-4, atol=1e-5)
        assert out.shape == (B_small, 1)
        assert bool(jnp.all(jnp.isfinite(out)))

    # Larger batch exercising padding + multi-step "parallel" batch grid.
    B_big = 300
    series_big = jax.random.normal(k_big, (B_big, T), dtype=jnp.float32) * 1.5
    v3_big, score_big = simple_program_forward(series_big, locate_w,
                                               operator_type='increase',
                                               get_score_also=True, b_tile=128)
    v3_big = jax.block_until_ready(v3_big)
    ref_v3_big, ref_score_big = _forward_ref(series_big, locate_w, 'increase')
    np.testing.assert_allclose(np.asarray(v3_big), np.asarray(ref_v3_big),
                               rtol=1e-4, atol=1e-5)
    np.testing.assert_allclose(np.asarray(score_big), np.asarray(ref_score_big),
                               rtol=1e-4, atol=1e-5)

    print("KERNEL_OK")
</pallas_src>

<mosaic_0001>
module attributes {stable_mosaic.version = 11 : i64} {
  func.func @_program_kernel(%arg0: i32, %arg1: memref<12x1xf32, #tpu.memory_space<vmem>>, %arg2: memref<12x128xf32, #tpu.memory_space<vmem>>, %arg3: memref<2x128xf32, #tpu.memory_space<vmem>>) attributes {dimension_semantics = [#tpu.dimension_semantics<parallel>], iteration_bounds = array<i64: 1>, scalar_prefetch = 0 : i64, scratch_operands = 0 : i64, tpu.core_type = #tpu.core_type<tc>, window_params = [{pipeline_mode = #tpu.pipeline_mode<synchronous>, transform_indices = @transform_0, window_bounds = array<i64: 12, 1>}, {transform_indices = @transform_1, window_bounds = array<i64: 12, 128>}, {transform_indices = @transform_2, window_bounds = array<i64: 2, 128>}]} {
    %c0 = arith.constant 0 : index
    %c0_0 = arith.constant 0 : index
    %0 = vector.load %arg2[%c0, %c0_0] : memref<12x128xf32, #tpu.memory_space<vmem>>, vector<12x128xf32>
    %1 = tpu.iota {dimensions = array<i32: 0>} : vector<12x128xi32>
    %2 = vector.extract_strided_slice %0 {offsets = [1, 0], sizes = [11, 128], strides = [1, 1]} : vector<12x128xf32> to vector<11x128xf32>
    %3 = vector.extract_strided_slice %0 {offsets = [0, 0], sizes = [1, 128], strides = [1, 1]} : vector<12x128xf32> to vector<1x128xf32>
    %4 = tpu.concatenate %2, %3 in 0 : vector<11x128xf32>, vector<1x128xf32> -> vector<12x128xf32>
    %c11_i32 = arith.constant 11 : i32
    %5 = vector.broadcast %c11_i32 : i32 to vector<12x128xi32>
    %6 = arith.cmpi slt, %1, %5 : vector<12x128xi32>
    %7 = arith.subf %4, %0 : vector<12x128xf32>
    %cst = arith.constant 1.000000e-01 : f32
    %8 = vector.broadcast %cst : f32 to vector<12x128xf32>
    %9 = arith.mulf %8, %7 : vector<12x128xf32>
    %cst_1 = arith.constant 0.000000e+00 : f32
    %10 = vector.broadcast %cst_1 : f32 to vector<12x128xf32>
    %11 = arith.select %6, %9, %10 : vector<12x128xi1>, vector<12x128xf32>
    %cst_2 = arith.constant 0.000000e+00 : f32
    %cst_3 = arith.constant 2.000000e-01 : f32
    %12 = vector.broadcast %cst_2 : f32 to vector<12x128xf32>
    %13 = arith.maximumf %12, %11 : vector<12x128xf32>
    %14 = vector.broadcast %cst_3 : f32 to vector<12x128xf32>
    %15 = arith.minimumf %14, %13 : vector<12x128xf32>
    %c11_i32_4 = arith.constant 11 : i32
    %16 = vector.broadcast %c11_i32_4 : i32 to vector<12x128xi32>
    %17 = arith.cmpi eq, %1, %16 : vector<12x128xi32>
    %18 = vector.extract_strided_slice %15 {offsets = [11, 0], sizes = [1, 128], strides = [1, 1]} : vector<12x128xf32> to vector<1x128xf32>
    %19 = vector.extract_strided_slice %15 {offsets = [0, 0], sizes = [11, 128], strides = [1, 1]} : vector<12x128xf32> to vector<11x128xf32>
    %20 = tpu.concatenate %18, %19 in 0 : vector<1x128xf32>, vector<11x128xf32> -> vector<12x128xf32>
    %21 = arith.select %17, %20, %15 : vector<12x128xi1>, vector<12x128xf32>
    %c0_5 = arith.constant 0 : index
    %c0_6 = arith.constant 0 : index
    %22 = vector.load %arg1[%c0_5, %c0_6] : memref<12x1xf32, #tpu.memory_space<vmem>>, vector<12x1xf32>
    %23 = vector.broadcast %22 : vector<12x1xf32> to vector<12x128xf32>
    %24 = arith.mulf %23, %21 : vector<12x128xf32>
    %cst_7 = arith.constant dense<0.000000e+00> : vector<128xf32>
    %25 = vector.multi_reduction <add>, %24, %cst_7 [0] : vector<12x128xf32> to vector<128xf32>
    %26 = vector.shape_cast %25 : vector<128xf32> to vector<1x128xf32>
    %cst_8 = arith.constant 4.000000e+00 : f32
    %27 = vector.broadcast %cst_8 : f32 to vector<1x128xf32>
    %28 = arith.mulf %27, %26 : vector<1x128xf32>
    %cst_9 = arith.constant -2.500000e-01 : f32
    %29 = vector.broadcast %cst_9 : f32 to vector<1x128xf32>
    %30 = arith.addf %28, %29 : vector<1x128xf32>
    %31 = arith.negf %30 : vector<1x128xf32>
    %32 = math.exp %31 : vector<1x128xf32>
    %cst_10 = arith.constant 1.000000e+00 : f32
    %33 = vector.broadcast %cst_10 : f32 to vector<1x128xf32>
    %34 = arith.addf %33, %32 : vector<1x128xf32>
    %35 = arith.divf %33, %34 : vector<1x128xf32>
    %c0_11 = arith.constant 0 : index
    %c0_12 = arith.constant 0 : index
    %36 = vector.load %arg3[%c0_11, %c0_12] : memref<2x128xf32, #tpu.memory_space<vmem>>, vector<1x128xf32>
    tpu.vector_store %arg3[%c0_11, %c0_12], %35 {strides = array<i32>} : memref<2x128xf32, #tpu.memory_space<vmem>>, vector<1x128xf32>,
    %c1 = arith.constant 1 : index
    %c0_13 = arith.constant 0 : index
    %37 = vector.load %arg3[%c1, %c0_13] : memref<2x128xf32, #tpu.memory_space<vmem>>, vector<1x128xf32>
    tpu.vector_store %arg3[%c1, %c0_13], %26 {strides = array<i32>} : memref<2x128xf32, #tpu.memory_space<vmem>>, vector<1x128xf32>,
    return
  }
  func.func @transform_0(%arg0: i32) -> (i32, i32) {
    %c0_i32 = arith.constant 0 : i32
    %c0_i32_0 = arith.constant 0 : i32
    %c0_i32_1 = arith.constant 0 : i32
    return %c0_i32, %c0_i32_0 : i32, i32
  }
  func.func @transform_1(%arg0: i32) -> (i32, i32) {
    %c0_i32 = arith.constant 0 : i32
    %c0_i32_0 = arith.constant 0 : i32
    return %c0_i32, %arg0 : i32, i32
  }
  func.func @transform_2(%arg0: i32) -> (i32, i32) {
    %c0_i32 = arith.constant 0 : i32
    %c0_i32_0 = arith.constant 0 : i32
    return %c0_i32, %arg0 : i32, i32
  }
}

</mosaic_0001>

<bundles_post_ra>
// kernel: simple_program_forward.1
= control target key start
LH: loop header
LB: loop body
LE: loop exit
PB: predicated region body
PF: predicated region fallthrough
CT: control target
= control target key end

     0   :  { %v99_v0 = vmov 0   ;;  %v13_v5 = vlaneseq  ;;  %vm26_vm0 = vcmask 1042432   ;;  %vm18_vm1 = vcmask 1046528   ;;  %s133_s0 = inlined_call_operand.vmem [shape: f32[12,1], index: 0, kind: input, shape index: {}]   ;;  %s134_s1 = inlined_call_operand.vmem [shape: f32[12,128], index: 1, kind: input, shape index: {}]   ;;  %s135_s2 = inlined_call_operand.vmem [shape: f32[2,128], index: 2, kind: output, shape index: {}]  }
   0x1   :  { %94 = vset.pattern.permute.xlu0 %v99_v0  ;;  %v56_v1 = vld [vmem:[%s133_s0 + $0x8] sm:$0xf]  ;;  %v55_v2 = vld [vmem:[%s133_s0] sm:$0xff]  ;;  %vm46_vm3 = vcmask 1040384   ;;  %vm69_vm5 = vcmask 1043456  }
   0x2   :  { %64 = vperm.xlu0 %94, %v56_v1   ;;  %v11_v3 = vld [vmem:[%s134_s1] sm:$0xff]  ;;  %v12_v4 = vld [vmem:[%s134_s1 + $0x8] sm:$0xf]  ;;  %v14_v9 = vshrl.u32 %v13_v5, 7 }
   0x3   :  { %v20_v6 = vrot.slane %v12_v4, 1  ;;  %v24_v7 = vrot.slane %v11_v3, 5  ;;  %v19_v8 = vrot.slane %v11_v3, 1 }
   0x4   :  { %v15_v13 = vadd.s32 8, %v14_v9 }
   0x5   :  { %v27_v10 = vsel %vm26_vm0, %v20_v6, %v24_v7  ;;  %v21_v11 = vsel %vm18_vm1, %v19_v8, %v20_v6 }
   0x6   :  { %59 = vperm.xlu0 %94, %v55_v2   ;;  %v31_v12 = vsub.f32 %v27_v10, %v12_v4  ;;  %v30_v14 = vsub.f32 %v21_v11, %v11_v3  ;;  %vm29_vm2 = vcmp.lt.s32.totalorder %v15_v13, 11  ;;  %vm41_vm4 = vcmp.eq.s32.totalorder %v15_v13, 11 }
   0x8   :  { %v33_v15 = vmul.f32 0.1, %v31_v12  ;;  %v32_v16 = vmul.f32 0.1, %v30_v14 }
   0xa   :  { %v35_v17 = vsel %vm29_vm2, %v33_v15, 0.0  ;;  %v36_v18 = vmax.f32 %v32_v16, 0.0 }
   0xb   :  { %v37_v19 = vmax.f32 %v35_v17, 0.0 }
   0xc   :  { %v38_v20 = vmin.f32 %v36_v18, 0.2 }
   0xd   :  { %v39_v21 = vmin.f32 %v37_v19, 0.2 }
   0xe   :  { %v47_v22 = vrot.slane %v38_v20, 7 }
   0xf   :  { %v48_v23 = vrot.slane %v39_v21, 7 }
  0x11   :  { %v49_v24 = vsel %vm46_vm3, %v47_v22, %v48_v23 }
  0x12   :  { %v54_v25 = vsel %vm41_vm4, %v49_v24, %v39_v21 }
  0x81   :  { %v65_v26 = vpop.permute.xlu0 %64 }
  0x82   :  { %v68_v27 = vmul.f32 %v65_v26, %v54_v25 }
  0x84   :  { %v70_v30 = vsel %vm69_vm5, %v68_v27, 0.0 }
  0x85   :  { %v60_v28 = vpop.permute.xlu0 %59 }
  0x86   :  { %v67_v29 = vmul.f32 %v60_v28, %v38_v20 }
  0x88   :  { %v71_v31 = vadd.f32 %v70_v30, %v67_v29 }
  0x8a   :  { %v72_v32 = vrot.slane %v71_v31, 4 }
  0x8c   :  { %v73_v33 = vadd.f32 %v72_v32, %v71_v31 }
  0x8e   :  { %v74_v34 = vrot.slane %v73_v33, 2 }
  0x90   :  { %v75_v35 = vadd.f32 %v74_v34, %v73_v33 }
  0x92   :  { %v76_v36 = vrot.slane %v75_v35, 1 }
  0x94   :  { %v77_v37 = vadd.f32 %v76_v36, %v75_v35 }
  0x96   :  { %v78_v38 = vmul.f32 4.0, %v77_v37  ;;  %87 = vst [vmem:[%s135_s2 + $0x1] sm:$0x1] %v77_v37 }
  0x98   :  { %v79_v39 = vadd.f32 -0.25, %v78_v38 }
  0x9a   :  { %v92_v40 = vmul.f32 -1.442695, %v79_v39 }
  0x9c   :  { %95 = vpow2.f32 %v92_v40 }
  0xa6   :  { %v96_v41 = vpop.eup %95 }
  0xa7   :  { %v83_v42 = vadd.f32 1.0, %v96_v41 }
  0xa9   :  { %97 = vrcp.f32 %v83_v42 }
  0xb3   :  { %v98_v43 = vpop.eup %97 }
  0xb4   :  { %86 = vst [vmem:[%s135_s2] sm:$0x1] %v98_v43 }

</bundles_post_ra>
